<compile_context>
chip_gen: v6e
topology: v6e:2x2x1
jax: 0.10.0
libtpu: 0.0.40
codegen_flags: <defaults>
</compile_context>

<pallas_src>
import functools

import jax
import jax.numpy as jnp
from jax.experimental import pallas as pl
from jax.experimental.pallas import tpu as pltpu


def _nll_partial_kernel(pred_ref, target_ref, out_ref, *, n_total, has_ragged):
    """Per-tile partial column-sum of pred[i, target[i]] over valid rows.

    pred_ref:   (T, C)    log-probabilities (any float dtype), VMEM tile
    target_ref: (T, 1)    int32 class indices, VMEM tile
    out_ref:    (1, 1, C) float32 partial column-sums for this tile
    """
    pred = pred_ref[...]                     # (T, C)
    tgt = target_ref[...]                    # (T, 1) int32
    t, c = pred.shape

    if has_ragged:
        # Invalidate out-of-range rows (last ragged tile): target -> -1 never
        # matches any class id, so those rows contribute exactly 0.
        i = pl.program_id(0)
        row_ids = jax.lax.broadcasted_iota(jnp.int32, (t, 1), 0) + i * t
        tgt = jnp.where(row_ids < n_total, tgt, jnp.int32(-1))

    class_ids = jax.lax.broadcasted_iota(jnp.int32, (t, c), dimension=1)
    picked = jnp.where(class_ids == tgt,
                       pred.astype(jnp.float32), jnp.float32(0.0))

    # Sublane (axis=0) reduction only; lane dim stays as a (1, 1, C) partial.
    out_ref[...] = jnp.sum(picked, axis=0).reshape(1, 1, c)


def _pick_tile_rows(n, c, itemsize, tile_n_max, budget_bytes=2 * 1024 * 1024):
    """Largest 8-aligned row tile whose pred block fits the VMEM budget."""
    if n <= tile_n_max and n * c * itemsize <= budget_bytes:
        return n  # single full-extent block (no raggedness, no mask)
    rows = min(tile_n_max, budget_bytes // max(1, c * itemsize))
    rows = max(8, (rows // 8) * 8)
    return rows


def get_loss(pred, target, trans_feat=None, *, tile_n_max=4096):
    """JAX/Pallas equivalent of the PyTorch get_loss.forward.

    pred:       (N, C) float log-probabilities (f32 or bf16)
    target:     (N,)   integer class indices
    trans_feat: unused (kept to mirror the PyTorch signature)
    """
    del trans_feat  # not used by the loss, just like the PyTorch module
    n, c = pred.shape
    target2d = target.astype(jnp.int32).reshape(n, 1)

    assert tile_n_max % 8 == 0, "tile_n_max must be a multiple of 8 (sublane)"
    itemsize = jnp.dtype(pred.dtype).itemsize
    tile_n = _pick_tile_rows(n, c, itemsize, tile_n_max)
    num_tiles = pl.cdiv(n, tile_n)
    has_ragged = (n % tile_n) != 0

    cost = pl.CostEstimate(
        flops=2 * n * c,
        transcendentals=0,
        bytes_accessed=n * c * itemsize + n * 4 + num_tiles * c * 4,
    )

    partials = pl.pallas_call(
        functools.partial(_nll_partial_kernel, n_total=n, has_ragged=has_ragged),
        out_shape=jax.ShapeDtypeStruct((num_tiles, 1, c), jnp.float32),
        grid=(num_tiles,),
        in_specs=[
            pl.BlockSpec((tile_n, c), lambda i: (i, 0)),   # pred rows
            pl.BlockSpec((tile_n, 1), lambda i: (i, 0)),   # targets
        ],
        out_specs=pl.BlockSpec((1, 1, c), lambda i: (i, 0, 0)),
        compiler_params=pltpu.CompilerParams(
            dimension_semantics=("parallel",),
            vmem_limit_bytes=32 * 1024 * 1024,
        ),
        cost_estimate=cost,
    )(pred, target2d)

    # Tiny finalize: sum the per-tile partials, negate, scale by 1/N once.
    return -jnp.sum(partials) * jnp.float32(1.0 / n)


if __name__ == "__main__":
    key = jax.random.PRNGKey(0)
    k_logits, k_target, k_trans = jax.random.split(key, 3)

    N, C = 8, 40  # small batch, 40 classes (PointNet++ cls-msg default)

    # pred must be log-probabilities (as produced by log_softmax upstream).
    logits = jax.random.normal(k_logits, (N, C), dtype=jnp.float32)
    pred = jax.nn.log_softmax(logits, axis=-1)
    target = jax.random.randint(k_target, (N,), 0, C, dtype=jnp.int32)
    trans_feat = jax.random.normal(k_trans, (N, 3, 3), dtype=jnp.float32)  # unused

    loss = jax.block_until_ready(get_loss(pred, target, trans_feat))
    ref = -jnp.mean(jnp.take_along_axis(pred, target[:, None], axis=1)[:, 0])
    assert jnp.allclose(loss, ref, atol=1e-5, rtol=1e-5), (loss, ref)

    # Exercise the multi-tile path with a ragged (masked) last tile.
    N2 = 20
    k2a, k2b = jax.random.split(jax.random.PRNGKey(1))
    pred2 = jax.nn.log_softmax(
        jax.random.normal(k2a, (N2, C), dtype=jnp.float32), axis=-1)
    target2 = jax.random.randint(k2b, (N2,), 0, C, dtype=jnp.int32)
    loss2 = jax.block_until_ready(get_loss(pred2, target2, None, tile_n_max=16))
    ref2 = -jnp.mean(jnp.take_along_axis(pred2, target2[:, None], axis=1)[:, 0])
    assert jnp.allclose(loss2, ref2, atol=1e-5, rtol=1e-5), (loss2, ref2)

    # Exercise the multi-tile, non-ragged path (mask code statically elided).
    N3 = 32
    k3a, k3b = jax.random.split(jax.random.PRNGKey(2))
    pred3 = jax.nn.log_softmax(
        jax.random.normal(k3a, (N3, C), dtype=jnp.float32), axis=-1)
    target3 = jax.random.randint(k3b, (N3,), 0, C, dtype=jnp.int32)
    loss3 = jax.block_until_ready(get_loss(pred3, target3, None, tile_n_max=16))
    ref3 = -jnp.mean(jnp.take_along_axis(pred3, target3[:, None], axis=1)[:, 0])
    assert jnp.allclose(loss3, ref3, atol=1e-5, rtol=1e-5), (loss3, ref3)

    print("KERNEL_OK")
</pallas_src>

<mosaic_0001>
module attributes {stable_mosaic.version = 11 : i64} {
  func.func @_nll_partial_kernel(%arg0: i32, %arg1: memref<8x40xf32, #tpu.memory_space<vmem>>, %arg2: memref<8x1xi32, #tpu.memory_space<vmem>>, %arg3: memref<1x1x40xf32, #tpu.memory_space<vmem>>) attributes {dimension_semantics = [#tpu.dimension_semantics<parallel>], iteration_bounds = array<i64: 1>, scalar_prefetch = 0 : i64, scratch_operands = 0 : i64, tpu.core_type = #tpu.core_type<tc>, window_params = [{transform_indices = @transform_0, window_bounds = array<i64: 8, 40>}, {transform_indices = @transform_1, window_bounds = array<i64: 8, 1>}, {transform_indices = @transform_2, window_bounds = array<i64: 1, 1, 40>}]} {
    %c0 = arith.constant 0 : index
    %c0_0 = arith.constant 0 : index
    %0 = vector.load %arg1[%c0, %c0_0] : memref<8x40xf32, #tpu.memory_space<vmem>>, vector<8x40xf32>
    %c0_1 = arith.constant 0 : index
    %c0_2 = arith.constant 0 : index
    %1 = vector.load %arg2[%c0_1, %c0_2] : memref<8x1xi32, #tpu.memory_space<vmem>>, vector<8x1xi32>
    %2 = tpu.iota {dimensions = array<i32: 1>} : vector<8x40xi32>
    %3 = vector.broadcast %1 : vector<8x1xi32> to vector<8x40xi32>
    %4 = arith.cmpi eq, %2, %3 : vector<8x40xi32>
    %cst = arith.constant 0.000000e+00 : f32
    %5 = vector.broadcast %cst : f32 to vector<8x40xf32>
    %6 = arith.select %4, %0, %5 : vector<8x40xi1>, vector<8x40xf32>
    %cst_3 = arith.constant dense<0.000000e+00> : vector<40xf32>
    %7 = vector.multi_reduction <add>, %6, %cst_3 [0] : vector<8x40xf32> to vector<40xf32>
    %8 = vector.shape_cast %7 : vector<40xf32> to vector<1x1x40xf32>
    %c0_4 = arith.constant 0 : index
    %c0_5 = arith.constant 0 : index
    %c0_6 = arith.constant 0 : index
    %9 = vector.load %arg3[%c0_4, %c0_5, %c0_6] : memref<1x1x40xf32, #tpu.memory_space<vmem>>, vector<1x1x40xf32>
    tpu.vector_store %arg3[%c0_4, %c0_5, %c0_6], %8 {strides = array<i32>} : memref<1x1x40xf32, #tpu.memory_space<vmem>>, vector<1x1x40xf32>,
    return
  }
  func.func @transform_0(%arg0: i32) -> (i32, i32) {
    %c0_i32 = arith.constant 0 : i32
    %c0_i32_0 = arith.constant 0 : i32
    return %arg0, %c0_i32 : i32, i32
  }
  func.func @transform_1(%arg0: i32) -> (i32, i32) {
    %c0_i32 = arith.constant 0 : i32
    %c0_i32_0 = arith.constant 0 : i32
    return %arg0, %c0_i32 : i32, i32
  }
  func.func @transform_2(%arg0: i32) -> (i32, i32, i32) {
    %c0_i32 = arith.constant 0 : i32
    %c0_i32_0 = arith.constant 0 : i32
    %c0_i32_1 = arith.constant 0 : i32
    return %arg0, %c0_i32, %c0_i32_0 : i32, i32, i32
  }
}

</mosaic_0001>

<bundles_post_ra>
// kernel: tpu_custom_call.1
= control target key start
LH: loop header
LB: loop body
LE: loop exit
PB: predicated region body
PF: predicated region fallthrough
CT: control target
= control target key end

     0   :  { %s96_s0 = inlined_call_operand.vmem [shape: f32[8,40], index: 0, kind: input, shape index: {}]   ;;  %s97_s1 = inlined_call_operand.vmem [shape: s32[8,1], index: 1, kind: input, shape index: {}]   ;;  %s98_s2 = inlined_call_operand.hbm [shape: f32[1,1,40], index: 2, kind: output, shape index: {}]  }
   0x1   :  { %v13_v0 = vld [vmem:[%s97_s1] sm:$0xff] }
   0x2   :  { %7 = vsyncpa [#allocation3], 0  ;;  %v70_v1 = vmov 0   ;;  %v14_v2 = vlaneseq  ;;  %v12_v4 = vld [vmem:[%s96_s0] sm:$0xff]  ;;  %vm21_vm0 = vcmask 326656   ;;  %s71_s1 = smov [#allocation2]  }
   0x3   :  { %47 = vset.pattern.permute.xlu0 %v70_v1  ;;  %s37_s13 = sshll.u32 %s71_s1, 4  ;;  %vm29_vm2 = vcmask 319488   ;;  %s38_s13 = int_to_ptr.vmem [resolvable:$true] %s37_s13 }
   0x4   :  { %17 = vperm.xlu0 %47, %v13_v0   ;;  %v15_v3 = vand.u32 127, %v14_v2  ;;  %s48_s14 = scalar_lea.vmem %s38_s13, 16  ;;  %s52_s15 = scalar_lea.vmem %s38_s13, 32 }
   0x5   :  { %p49_p0 = scmp.ne.s32.totalorder %s38_s13, %s48_s14  ;;  %p53_p1 = scmp.lt.s32.totalorder %s38_s13, %s38_s13 }
   0x6   :  { %p54_p2 = scmp.lt.s32.totalorder %s52_s15, %s48_s14 }
   0x8   :  { %p55_p3 = por %p54_p2, %p53_p1 }
   0xa   :  { %p56_p4 = pnand %p55_p3, %p49_p0 }
  0x7f   :  { %v18_v5 = vpop.permute.xlu0 %17 }
  0x80   :  { %vm19_vm1 = vcmp.eq.s32.totalorder %v15_v3, %v18_v5 }
  0x81   :  { %v20_v6 = vsel %vm19_vm1, %v12_v4, 0.0 }
  0x82   :  { %v22_v7 = vsel %vm21_vm0, %v20_v6, 0.0 }
  0x83   :  { %v23_v8 = vrot.slane %v22_v7, 4 }
  0x85   :  { %v24_v9 = vadd.f32 %v23_v8, %v22_v7 }
  0x87   :  { %v25_v10 = vrot.slane %v24_v9, 2 }
  0x89   :  { %v26_v11 = vadd.f32 %v25_v10, %v24_v9 }
  0x8b   :  { %v27_v12 = vrot.slane %v26_v11, 1 }
  0x8d   :  { %v28_v13 = vadd.f32 %v27_v12, %v26_v11 }
  0x8f   :  { %30 = vst.msk [vmem:[#allocation2] sm:$0x1] %vm29_vm2, %v28_v13 }
  0x90   :  { %59 = shalt.err (!%p56_p4)
}
  0x91   :  { %40 = dma.vmem_to_hbm [thread:$0]  %s38_s13, 16, %s98_s2, [#allocation3]  }
  0x92   :  { %68 = dma.done.wait [#allocation3], 16  }
  0x93   :  { %69 = vsyncadd [#allocation3], 4294967280 }
  0x94   :  { %44 = vsyncpa [#allocation3], 1 }

</bundles_post_ra>
